<compile_context>
chip_gen: v7x
topology: tpu7x:2x2x1
jax: 0.10.0
libtpu: 0.0.40
codegen_flags: <defaults>
</compile_context>

<pallas_src>
import functools

import jax
import jax.numpy as jnp
from jax import lax
from jax.experimental import pallas as pl
from jax.experimental.pallas import tpu as pltpu

# ---------------- model hyper-parameters (small, deterministic) --------------
B = 2          # batch
L = 16         # sequence length
D = 128        # hidden size
V = 256        # vocab size
K = 4          # short-conv filter taps (causal)
N_LAYERS = 2
EPS = 1e-5
BL = B * L     # flattened batch*sequence rows (sublane axis)

assert L & (L - 1) == 0, "in-kernel pos uses a bit-and; L must be a power of 2"


# ------------------------------ fused kernel body -----------------------------
def _forward_body(ids_ref, emb_ref, w_in_ref, conv_w_ref, w_out_ref,
                  w_unemb_ref):
    """Fused forward; returns (logits, pos, onehot) as in-register values."""
    ids = ids_ref[...]                                        # (BL, 1) i32

    # Embedding gather as a one-hot bf16 matmul (MXU); exact for bf16 table.
    col_v = lax.broadcasted_iota(jnp.int32, (BL, V), 1)
    onehot = (col_v == ids).astype(jnp.float32)               # (BL, V)
    x = jnp.dot(onehot.astype(jnp.bfloat16), emb_ref[...],
                preferred_element_type=jnp.float32)           # (BL, D) f32

    # Within-sequence position, derived in-kernel (L is a power of two).
    pos = lax.broadcasted_iota(jnp.int32, (BL, 1), 0) & (L - 1)

    # Causal masks hoisted out of the layer loop (reused by every layer).
    masks = tuple(pos >= j for j in range(1, K))

    for layer in range(N_LAYERS):        # static unroll (N_LAYERS is tiny)
        cw = conv_w_ref[layer]           # (K, D) f32

        # RMSNorm (gamma folded into w_in at init)
        ms = jnp.mean(x * x, axis=-1, keepdims=True)
        xn = x * jax.lax.rsqrt(ms + EPS)

        # input projection D -> 3D: bf16 operands, f32 accumulation (MXU)
        proj = jnp.dot(xn.astype(jnp.bfloat16), w_in_ref[layer],
                       preferred_element_type=jnp.float32)    # (BL, 3D)
        q = proj[:, :D]
        k = proj[:, D:2 * D]
        v = proj[:, 2 * D:]

        # causal depthwise short conv: k_conv[t] = sum_j cw[j] * k[t - j]
        # Sublane roll (XLU) + mask; the mask (pos >= j) also zeroes rows that
        # would leak across the batch seam of the flattened (B*L) axis.
        k_conv = cw[0:1, :] * k
        for j in range(1, K):
            shifted = pltpu.roll(k, shift=j, axis=0)
            shifted = jnp.where(masks[j - 1], shifted, 0.0)
            k_conv = k_conv + cw[j:j + 1, :] * shifted

        # gating + output projection + residual
        y = q * k_conv * v
        out = jnp.dot(y.astype(jnp.bfloat16), w_out_ref[layer],
                      preferred_element_type=jnp.float32)
        x = x + out

    # final RMSNorm (gamma_f folded into w_unemb) + unembed
    ms = jnp.mean(x * x, axis=-1, keepdims=True)
    hn = x * jax.lax.rsqrt(ms + EPS)
    logits = jnp.dot(hn.astype(jnp.bfloat16), w_unemb_ref[...],
                     preferred_element_type=jnp.float32)      # (BL, V) f32
    return logits, pos, onehot


def logits_kernel(ids_ref, emb_ref, w_in_ref, conv_w_ref, w_out_ref,
                  w_unemb_ref, logits_ref):
    logits, _, _ = _forward_body(ids_ref, emb_ref, w_in_ref, conv_w_ref,
                                 w_out_ref, w_unemb_ref)
    logits_ref[...] = logits


def loss_kernel(ids_ref, emb_ref, w_in_ref, conv_w_ref, w_out_ref,
                w_unemb_ref, loss_ref):
    """Fused forward + shifted mean cross-entropy; only a scalar leaves VMEM."""
    logits, pos, onehot = _forward_body(ids_ref, emb_ref, w_in_ref, conv_w_ref,
                                        w_out_ref, w_unemb_ref)
    # labels[t] = ids[t+1]: roll the one-hot by BL-1 (== -1 circularly); the
    # wrap-around rows are masked below by pos < L-1.
    onehot_next = pltpu.roll(onehot, shift=BL - 1, axis=0)    # (BL, V)
    m = jnp.max(logits, axis=-1, keepdims=True)
    lse = m + jnp.log(jnp.sum(jnp.exp(logits - m), axis=-1, keepdims=True))
    label_logit = jnp.sum(logits * onehot_next, axis=-1, keepdims=True)
    nll = lse - label_logit                                   # (BL, 1)
    valid = pos < (L - 1)                 # drop last position of each sequence
    total = jnp.sum(jnp.where(valid, nll, 0.0), axis=0, keepdims=True)
    loss_ref[...] = total / float(B * (L - 1))


# ------------------------------ pallas wrappers -------------------------------
_VMEM = pl.BlockSpec(memory_space=pltpu.MemorySpace.VMEM)   # whole array, VMEM
_N_INPUTS = 6   # ids, emb, w_in, conv_w, w_out, w_unemb


def run_forward_logits(ids, params):
    logits = pl.pallas_call(
        logits_kernel,
        out_shape=jax.ShapeDtypeStruct((BL, V), jnp.float32),
        in_specs=[_VMEM] * _N_INPUTS,
        out_specs=_VMEM,
    )(ids, params["emb"], params["w_in"], params["conv_w"], params["w_out"],
      params["w_unemb"])
    return logits.reshape(B, L, V)


def run_forward_loss(ids, params):
    loss = pl.pallas_call(
        loss_kernel,
        out_shape=jax.ShapeDtypeStruct((1, 1), jnp.float32),
        in_specs=[_VMEM] * _N_INPUTS,
        out_specs=_VMEM,
    )(ids, params["emb"], params["w_in"], params["conv_w"], params["w_out"],
      params["w_unemb"])
    return loss[0, 0]


# ------------------------------ params / forward ------------------------------
def init_params(key):
    keys = jax.random.split(key, 2 + 4 * N_LAYERS)
    it = iter(keys)
    params = {}
    emb = jax.random.normal(next(it), (V, D), jnp.float32) * 0.02
    params["emb"] = emb.astype(jnp.bfloat16)                  # (V, D) bf16
    w_in_l, conv_l, w_out_l = [], [], []
    for _ in range(N_LAYERS):
        w_in = jax.random.normal(next(it), (D, 3 * D), jnp.float32) / jnp.sqrt(D)
        gamma = jnp.ones((D,), jnp.float32)        # RMSNorm scale, folded below
        conv_l.append(jax.random.normal(next(it), (K, D), jnp.float32) * 0.3)
        w_out_l.append(jax.random.normal(next(it), (D, D), jnp.float32)
                       / jnp.sqrt(D))
        _ = next(it)  # consumed for deterministic key layout
        w_in_l.append(w_in * gamma[:, None])       # fold diag(gamma) @ W_in
    params["w_in"] = jnp.stack(w_in_l).astype(jnp.bfloat16)   # (NL, D, 3D)
    params["conv_w"] = jnp.stack(conv_l)                      # (NL, K, D) f32
    params["w_out"] = jnp.stack(w_out_l).astype(jnp.bfloat16) # (NL, D, D)
    gamma_f = jnp.ones((D,), jnp.float32)
    w_unemb = jax.random.normal(next(it), (D, V), jnp.float32) / jnp.sqrt(D)
    params["w_unemb"] = (w_unemb * gamma_f[:, None]).astype(jnp.bfloat16)
    return params


@functools.partial(jax.jit, static_argnames=("return_type",))
def evo2_forward(input_ids, params, return_type=None):
    # Only glue: flatten the token ids; everything else happens in the kernel.
    ids = input_ids.reshape(BL, 1).astype(jnp.int32)
    if return_type == "loss":
        return run_forward_loss(ids, params)
    return run_forward_logits(ids, params)


# ------------------------------ pure-JAX reference ----------------------------
def evo2_forward_ref(input_ids, params, return_type=None):
    x = jnp.take(params["emb"], input_ids.reshape(-1), axis=0)
    x = x.astype(jnp.float32)
    for layer in range(N_LAYERS):
        ms = jnp.mean(x * x, axis=-1, keepdims=True)
        xn = x * jax.lax.rsqrt(ms + EPS)            # gamma folded into w_in
        proj = jnp.dot(xn.astype(jnp.bfloat16), params["w_in"][layer],
                       preferred_element_type=jnp.float32)
        q, k, v = proj[:, :D], proj[:, D:2 * D], proj[:, 2 * D:]
        k3 = k.reshape(B, L, D)
        k_conv = jnp.zeros_like(k3)
        for j in range(K):
            coef = params["conv_w"][layer, j][None, None, :]
            shifted = jnp.pad(k3, ((0, 0), (j, 0), (0, 0)))[:, :L, :]
            k_conv = k_conv + coef * shifted
        y = q * k_conv.reshape(BL, D) * v
        out = jnp.dot(y.astype(jnp.bfloat16), params["w_out"][layer],
                      preferred_element_type=jnp.float32)
        x = x + out
    ms = jnp.mean(x * x, axis=-1, keepdims=True)
    hn = x * jax.lax.rsqrt(ms + EPS)                # gamma_f folded into w_unemb
    logits = jnp.dot(hn.astype(jnp.bfloat16), params["w_unemb"],
                     preferred_element_type=jnp.float32).reshape(B, L, V)
    if return_type == "loss":
        sl = logits[:, :-1, :].reshape(-1, V)
        lab = input_ids[:, 1:].reshape(-1)
        lse = jax.scipy.special.logsumexp(sl, axis=-1)
        picked = jnp.take_along_axis(sl, lab[:, None], axis=-1)[:, 0]
        return jnp.mean(lse - picked)
    return logits


# TODO(synk): run_with_hooks (PyTorch forward-hook mutation on named submodules)
# has no clean Pallas equivalent; only the hook-free forward path is implemented.


if __name__ == "__main__":
    key = jax.random.PRNGKey(0)
    pkey, ikey = jax.random.split(key)
    params = init_params(pkey)
    input_ids = jax.random.randint(ikey, (B, L), 0, V, dtype=jnp.int32)

    logits = evo2_forward(input_ids, params)                     # return_type=None
    loss = evo2_forward(input_ids, params, return_type="loss")   # return_type='loss'
    jax.block_until_ready(logits)
    jax.block_until_ready(loss)

    assert logits.shape == (B, L, V)
    assert loss.shape == ()
    assert bool(jnp.isfinite(loss))

    # correctness vs. pure-JAX reference (same bf16-matmul recipe)
    ref_logits = evo2_forward_ref(input_ids, params)
    ref_loss = evo2_forward_ref(input_ids, params, return_type="loss")
    assert bool(jnp.allclose(logits, ref_logits, atol=2e-2, rtol=2e-2))
    assert bool(jnp.allclose(loss, ref_loss, atol=2e-2, rtol=2e-2))

    print("KERNEL_OK")
</pallas_src>

<mosaic_0001>
module attributes {stable_mosaic.version = 11 : i64} {
  func.func @logits_kernel(%arg0: memref<32x1xi32, #tpu.memory_space<vmem>>, %arg1: memref<256x128xbf16, #tpu.memory_space<vmem>>, %arg2: memref<2x128x384xbf16, #tpu.memory_space<vmem>>, %arg3: memref<2x4x128xf32, #tpu.memory_space<vmem>>, %arg4: memref<2x128x128xbf16, #tpu.memory_space<vmem>>, %arg5: memref<128x256xbf16, #tpu.memory_space<vmem>>, %arg6: memref<32x256xf32, #tpu.memory_space<vmem>>) attributes {dimension_semantics = [], scalar_prefetch = 0 : i64, scratch_operands = 0 : i64, tpu.core_type = #tpu.core_type<tc>} {
    %c0 = arith.constant 0 : index
    %c0_0 = arith.constant 0 : index
    %0 = vector.load %arg0[%c0, %c0_0] : memref<32x1xi32, #tpu.memory_space<vmem>>, vector<32x1xi32>
    %1 = tpu.iota {dimensions = array<i32: 1>} : vector<32x256xi32>
    %2 = vector.broadcast %0 : vector<32x1xi32> to vector<32x256xi32>
    %3 = arith.cmpi eq, %1, %2 : vector<32x256xi32>
    %4 = arith.extui %3 : vector<32x256xi1> to vector<32x256xi32>
    %5 = arith.sitofp %4 : vector<32x256xi32> to vector<32x256xf32>
    %6 = arith.truncf %5 : vector<32x256xf32> to vector<32x256xbf16>
    %c0_1 = arith.constant 0 : index
    %c0_2 = arith.constant 0 : index
    %7 = vector.load %arg1[%c0_1, %c0_2] : memref<256x128xbf16, #tpu.memory_space<vmem>>, vector<256x128xbf16>
    %cst = arith.constant dense<0.000000e+00> : vector<32x128xf32>
    %8 = tpu.matmul %6, %7, %cst {dimension_numbers = #tpu.dot_dimension_numbers<[1], [0], [0], [1], [0, 0, 1, 1], [], []>} : vector<32x256xbf16>, vector<256x128xbf16>, vector<32x128xf32> -> vector<32x128xf32>
    %9 = tpu.iota {dimensions = array<i32: 0>} : vector<32x1xi32>
    %c15_i32 = arith.constant 15 : i32
    %10 = vector.broadcast %c15_i32 : i32 to vector<32x1xi32>
    %11 = arith.andi %9, %10 : vector<32x1xi32>
    %c1_i32 = arith.constant 1 : i32
    %12 = vector.broadcast %c1_i32 : i32 to vector<32x1xi32>
    %13 = arith.cmpi sge, %11, %12 : vector<32x1xi32>
    %c2_i32 = arith.constant 2 : i32
    %14 = vector.broadcast %c2_i32 : i32 to vector<32x1xi32>
    %15 = arith.cmpi sge, %11, %14 : vector<32x1xi32>
    %c3_i32 = arith.constant 3 : i32
    %16 = vector.broadcast %c3_i32 : i32 to vector<32x1xi32>
    %17 = arith.cmpi sge, %11, %16 : vector<32x1xi32>
    %c0_3 = arith.constant 0 : index
    %c0_4 = arith.constant 0 : index
    %c0_5 = arith.constant 0 : index
    %18 = vector.load %arg3[%c0_3, %c0_4, %c0_5] : memref<2x4x128xf32, #tpu.memory_space<vmem>>, vector<1x4x128xf32>
    %19 = vector.shape_cast %18 : vector<1x4x128xf32> to vector<4x128xf32>
    %20 = arith.mulf %8, %8 : vector<32x128xf32>
    %cst_6 = arith.constant dense<0.000000e+00> : vector<32xf32>
    %21 = vector.multi_reduction <add>, %20, %cst_6 [1] : vector<32x128xf32> to vector<32xf32>
    %22 = vector.shape_cast %21 : vector<32xf32> to vector<32x1xf32>
    %cst_7 = arith.constant 1.280000e+02 : f32
    %23 = vector.broadcast %cst_7 : f32 to vector<32x1xf32>
    %24 = arith.divf %22, %23 : vector<32x1xf32>
    %cst_8 = arith.constant 9.99999974E-6 : f32
    %25 = vector.broadcast %cst_8 : f32 to vector<32x1xf32>
    %26 = arith.addf %24, %25 : vector<32x1xf32>
    %27 = math.rsqrt %26 : vector<32x1xf32>
    %28 = vector.broadcast %27 : vector<32x1xf32> to vector<32x128xf32>
    %29 = arith.mulf %8, %28 : vector<32x128xf32>
    %30 = arith.truncf %29 : vector<32x128xf32> to vector<32x128xbf16>
    %c0_9 = arith.constant 0 : index
    %c0_10 = arith.constant 0 : index
    %c0_11 = arith.constant 0 : index
    %31 = vector.load %arg2[%c0_9, %c0_10, %c0_11] : memref<2x128x384xbf16, #tpu.memory_space<vmem>>, vector<1x128x384xbf16>
    %32 = vector.shape_cast %31 : vector<1x128x384xbf16> to vector<128x384xbf16>
    %cst_12 = arith.constant dense<0.000000e+00> : vector<32x384xf32>
    %33 = tpu.matmul %30, %32, %cst_12 {dimension_numbers = #tpu.dot_dimension_numbers<[1], [0], [0], [1], [0, 0, 1, 1], [], []>} : vector<32x128xbf16>, vector<128x384xbf16>, vector<32x384xf32> -> vector<32x384xf32>
    %34 = vector.extract_strided_slice %33 {offsets = [0, 0], sizes = [32, 128], strides = [1, 1]} : vector<32x384xf32> to vector<32x128xf32>
    %35 = vector.extract_strided_slice %33 {offsets = [0, 128], sizes = [32, 128], strides = [1, 1]} : vector<32x384xf32> to vector<32x128xf32>
    %36 = vector.extract_strided_slice %33 {offsets = [0, 256], sizes = [32, 128], strides = [1, 1]} : vector<32x384xf32> to vector<32x128xf32>
    %37 = vector.extract_strided_slice %19 {offsets = [0, 0], sizes = [1, 128], strides = [1, 1]} : vector<4x128xf32> to vector<1x128xf32>
    %38 = vector.broadcast %37 : vector<1x128xf32> to vector<32x128xf32>
    %39 = arith.mulf %38, %35 : vector<32x128xf32>
    %c1_i32_13 = arith.constant 1 : i32
    %40 = tpu.dynamic_rotate %35 by %c1_i32_13 dim 0 : vector<32x128xf32>, i32 -> vector<32x128xf32>
    %cst_14 = arith.constant 0.000000e+00 : f32
    %41 = vector.shape_cast %13 : vector<32x1xi1> to vector<32x1xi1>
    %42 = vector.broadcast %41 : vector<32x1xi1> to vector<32x128xi1>
    %43 = vector.broadcast %cst_14 : f32 to vector<32x128xf32>
    %44 = arith.select %42, %40, %43 : vector<32x128xi1>, vector<32x128xf32>
    %45 = vector.extract_strided_slice %19 {offsets = [1, 0], sizes = [1, 128], strides = [1, 1]} : vector<4x128xf32> to vector<1x128xf32>
    %46 = vector.broadcast %45 : vector<1x128xf32> to vector<32x128xf32>
    %47 = arith.mulf %46, %44 : vector<32x128xf32>
    %48 = arith.addf %39, %47 : vector<32x128xf32>
    %c2_i32_15 = arith.constant 2 : i32
    %49 = tpu.dynamic_rotate %35 by %c2_i32_15 dim 0 : vector<32x128xf32>, i32 -> vector<32x128xf32>
    %cst_16 = arith.constant 0.000000e+00 : f32
    %50 = vector.shape_cast %15 : vector<32x1xi1> to vector<32x1xi1>
    %51 = vector.broadcast %50 : vector<32x1xi1> to vector<32x128xi1>
    %52 = vector.broadcast %cst_16 : f32 to vector<32x128xf32>
    %53 = arith.select %51, %49, %52 : vector<32x128xi1>, vector<32x128xf32>
    %54 = vector.extract_strided_slice %19 {offsets = [2, 0], sizes = [1, 128], strides = [1, 1]} : vector<4x128xf32> to vector<1x128xf32>
    %55 = vector.broadcast %54 : vector<1x128xf32> to vector<32x128xf32>
    %56 = arith.mulf %55, %53 : vector<32x128xf32>
    %57 = arith.addf %48, %56 : vector<32x128xf32>
    %c3_i32_17 = arith.constant 3 : i32
    %58 = tpu.dynamic_rotate %35 by %c3_i32_17 dim 0 : vector<32x128xf32>, i32 -> vector<32x128xf32>
    %cst_18 = arith.constant 0.000000e+00 : f32
    %59 = vector.shape_cast %17 : vector<32x1xi1> to vector<32x1xi1>
    %60 = vector.broadcast %59 : vector<32x1xi1> to vector<32x128xi1>
    %61 = vector.broadcast %cst_18 : f32 to vector<32x128xf32>
    %62 = arith.select %60, %58, %61 : vector<32x128xi1>, vector<32x128xf32>
    %63 = vector.extract_strided_slice %19 {offsets = [3, 0], sizes = [1, 128], strides = [1, 1]} : vector<4x128xf32> to vector<1x128xf32>
    %64 = vector.broadcast %63 : vector<1x128xf32> to vector<32x128xf32>
    %65 = arith.mulf %64, %62 : vector<32x128xf32>
    %66 = arith.addf %57, %65 : vector<32x128xf32>
    %67 = arith.mulf %34, %66 : vector<32x128xf32>
    %68 = arith.mulf %67, %36 : vector<32x128xf32>
    %69 = arith.truncf %68 : vector<32x128xf32> to vector<32x128xbf16>
    %c0_19 = arith.constant 0 : index
    %c0_20 = arith.constant 0 : index
    %c0_21 = arith.constant 0 : index
    %70 = vector.load %arg4[%c0_19, %c0_20, %c0_21] : memref<2x128x128xbf16, #tpu.memory_space<vmem>>, vector<1x128x128xbf16>
    %71 = vector.shape_cast %70 : vector<1x128x128xbf16> to vector<128x128xbf16>
    %cst_22 = arith.constant dense<0.000000e+00> : vector<32x128xf32>
    %72 = tpu.matmul %69, %71, %cst_22 {dimension_numbers = #tpu.dot_dimension_numbers<[1], [0], [0], [1], [0, 0, 1, 1], [], []>} : vector<32x128xbf16>, vector<128x128xbf16>, vector<32x128xf32> -> vector<32x128xf32>
    %73 = arith.addf %8, %72 : vector<32x128xf32>
    %c1 = arith.constant 1 : index
    %c0_23 = arith.constant 0 : index
    %c0_24 = arith.constant 0 : index
    %74 = vector.load %arg3[%c1, %c0_23, %c0_24] : memref<2x4x128xf32, #tpu.memory_space<vmem>>, vector<1x4x128xf32>
    %75 = vector.shape_cast %74 : vector<1x4x128xf32> to vector<4x128xf32>
    %76 = arith.mulf %73, %73 : vector<32x128xf32>
    %cst_25 = arith.constant dense<0.000000e+00> : vector<32xf32>
    %77 = vector.multi_reduction <add>, %76, %cst_25 [1] : vector<32x128xf32> to vector<32xf32>
    %78 = vector.shape_cast %77 : vector<32xf32> to vector<32x1xf32>
    %cst_26 = arith.constant 1.280000e+02 : f32
    %79 = vector.broadcast %cst_26 : f32 to vector<32x1xf32>
    %80 = arith.divf %78, %79 : vector<32x1xf32>
    %cst_27 = arith.constant 9.99999974E-6 : f32
    %81 = vector.broadcast %cst_27 : f32 to vector<32x1xf32>
    %82 = arith.addf %80, %81 : vector<32x1xf32>
    %83 = math.rsqrt %82 : vector<32x1xf32>
    %84 = vector.broadcast %83 : vector<32x1xf32> to vector<32x128xf32>
    %85 = arith.mulf %73, %84 : vector<32x128xf32>
    %86 = arith.truncf %85 : vector<32x128xf32> to vector<32x128xbf16>
    %c1_28 = arith.constant 1 : index
    %c0_29 = arith.constant 0 : index
    %c0_30 = arith.constant 0 : index
    %87 = vector.load %arg2[%c1_28, %c0_29, %c0_30] : memref<2x128x384xbf16, #tpu.memory_space<vmem>>, vector<1x128x384xbf16>
    %88 = vector.shape_cast %87 : vector<1x128x384xbf16> to vector<128x384xbf16>
    %cst_31 = arith.constant dense<0.000000e+00> : vector<32x384xf32>
    %89 = tpu.matmul %86, %88, %cst_31 {dimension_numbers = #tpu.dot_dimension_numbers<[1], [0], [0], [1], [0, 0, 1, 1], [], []>} : vector<32x128xbf16>, vector<128x384xbf16>, vector<32x384xf32> -> vector<32x384xf32>
    %90 = vector.extract_strided_slice %89 {offsets = [0, 0], sizes = [32, 128], strides = [1, 1]} : vector<32x384xf32> to vector<32x128xf32>
    %91 = vector.extract_strided_slice %89 {offsets = [0, 128], sizes = [32, 128], strides = [1, 1]} : vector<32x384xf32> to vector<32x128xf32>
    %92 = vector.extract_strided_slice %89 {offsets = [0, 256], sizes = [32, 128], strides = [1, 1]} : vector<32x384xf32> to vector<32x128xf32>
    %93 = vector.extract_strided_slice %75 {offsets = [0, 0], sizes = [1, 128], strides = [1, 1]} : vector<4x128xf32> to vector<1x128xf32>
    %94 = vector.broadcast %93 : vector<1x128xf32> to vector<32x128xf32>
    %95 = arith.mulf %94, %91 : vector<32x128xf32>
    %c1_i32_32 = arith.constant 1 : i32
    %96 = tpu.dynamic_rotate %91 by %c1_i32_32 dim 0 : vector<32x128xf32>, i32 -> vector<32x128xf32>
    %cst_33 = arith.constant 0.000000e+00 : f32
    %97 = vector.shape_cast %13 : vector<32x1xi1> to vector<32x1xi1>
    %98 = vector.broadcast %97 : vector<32x1xi1> to vector<32x128xi1>
    %99 = vector.broadcast %cst_33 : f32 to vector<32x128xf32>
    %100 = arith.select %98, %96, %99 : vector<32x128xi1>, vector<32x128xf32>
    %101 = vector.extract_strided_slice %75 {offsets = [1, 0], sizes = [1, 128], strides = [1, 1]} : vector<4x128xf32> to vector<1x128xf32>
    %102 = vector.broadcast %101 : vector<1x128xf32> to vector<32x128xf32>
    %103 = arith.mulf %102, %100 : vector<32x128xf32>
    %104 = arith.addf %95, %103 : vector<32x128xf32>
    %c2_i32_34 = arith.constant 2 : i32
    %105 = tpu.dynamic_rotate %91 by %c2_i32_34 dim 0 : vector<32x128xf32>, i32 -> vector<32x128xf32>
    %cst_35 = arith.constant 0.000000e+00 : f32
    %106 = vector.shape_cast %15 : vector<32x1xi1> to vector<32x1xi1>
    %107 = vector.broadcast %106 : vector<32x1xi1> to vector<32x128xi1>
    %108 = vector.broadcast %cst_35 : f32 to vector<32x128xf32>
    %109 = arith.select %107, %105, %108 : vector<32x128xi1>, vector<32x128xf32>
    %110 = vector.extract_strided_slice %75 {offsets = [2, 0], sizes = [1, 128], strides = [1, 1]} : vector<4x128xf32> to vector<1x128xf32>
    %111 = vector.broadcast %110 : vector<1x128xf32> to vector<32x128xf32>
    %112 = arith.mulf %111, %109 : vector<32x128xf32>
    %113 = arith.addf %104, %112 : vector<32x128xf32>
    %c3_i32_36 = arith.constant 3 : i32
    %114 = tpu.dynamic_rotate %91 by %c3_i32_36 dim 0 : vector<32x128xf32>, i32 -> vector<32x128xf32>
    %cst_37 = arith.constant 0.000000e+00 : f32
    %115 = vector.shape_cast %17 : vector<32x1xi1> to vector<32x1xi1>
    %116 = vector.broadcast %115 : vector<32x1xi1> to vector<32x128xi1>
    %117 = vector.broadcast %cst_37 : f32 to vector<32x128xf32>
    %118 = arith.select %116, %114, %117 : vector<32x128xi1>, vector<32x128xf32>
    %119 = vector.extract_strided_slice %75 {offsets = [3, 0], sizes = [1, 128], strides = [1, 1]} : vector<4x128xf32> to vector<1x128xf32>
    %120 = vector.broadcast %119 : vector<1x128xf32> to vector<32x128xf32>
    %121 = arith.mulf %120, %118 : vector<32x128xf32>
    %122 = arith.addf %113, %121 : vector<32x128xf32>
    %123 = arith.mulf %90, %122 : vector<32x128xf32>
    %124 = arith.mulf %123, %92 : vector<32x128xf32>
    %125 = arith.truncf %124 : vector<32x128xf32> to vector<32x128xbf16>
    %c1_38 = arith.constant 1 : index
    %c0_39 = arith.constant 0 : index
    %c0_40 = arith.constant 0 : index
    %126 = vector.load %arg4[%c1_38, %c0_39, %c0_40] : memref<2x128x128xbf16, #tpu.memory_space<vmem>>, vector<1x128x128xbf16>
    %127 = vector.shape_cast %126 : vector<1x128x128xbf16> to vector<128x128xbf16>
    %cst_41 = arith.constant dense<0.000000e+00> : vector<32x128xf32>
    %128 = tpu.matmul %125, %127, %cst_41 {dimension_numbers = #tpu.dot_dimension_numbers<[1], [0], [0], [1], [0, 0, 1, 1], [], []>} : vector<32x128xbf16>, vector<128x128xbf16>, vector<32x128xf32> -> vector<32x128xf32>
    %129 = arith.addf %73, %128 : vector<32x128xf32>
    %130 = arith.mulf %129, %129 : vector<32x128xf32>
    %cst_42 = arith.constant dense<0.000000e+00> : vector<32xf32>
    %131 = vector.multi_reduction <add>, %130, %cst_42 [1] : vector<32x128xf32> to vector<32xf32>
    %132 = vector.shape_cast %131 : vector<32xf32> to vector<32x1xf32>
    %cst_43 = arith.constant 1.280000e+02 : f32
    %133 = vector.broadcast %cst_43 : f32 to vector<32x1xf32>
    %134 = arith.divf %132, %133 : vector<32x1xf32>
    %cst_44 = arith.constant 9.99999974E-6 : f32
    %135 = vector.broadcast %cst_44 : f32 to vector<32x1xf32>
    %136 = arith.addf %134, %135 : vector<32x1xf32>
    %137 = math.rsqrt %136 : vector<32x1xf32>
    %138 = vector.broadcast %137 : vector<32x1xf32> to vector<32x128xf32>
    %139 = arith.mulf %129, %138 : vector<32x128xf32>
    %140 = arith.truncf %139 : vector<32x128xf32> to vector<32x128xbf16>
    %c0_45 = arith.constant 0 : index
    %c0_46 = arith.constant 0 : index
    %141 = vector.load %arg5[%c0_45, %c0_46] : memref<128x256xbf16, #tpu.memory_space<vmem>>, vector<128x256xbf16>
    %cst_47 = arith.constant dense<0.000000e+00> : vector<32x256xf32>
    %142 = tpu.matmul %140, %141, %cst_47 {dimension_numbers = #tpu.dot_dimension_numbers<[1], [0], [0], [1], [0, 0, 1, 1], [], []>} : vector<32x128xbf16>, vector<128x256xbf16>, vector<32x256xf32> -> vector<32x256xf32>
    %c0_48 = arith.constant 0 : index
    %c0_49 = arith.constant 0 : index
    %143 = vector.load %arg6[%c0_48, %c0_49] : memref<32x256xf32, #tpu.memory_space<vmem>>, vector<32x256xf32>
    tpu.vector_store %arg6[%c0_48, %c0_49], %142 {strides = array<i32>} : memref<32x256xf32, #tpu.memory_space<vmem>>, vector<32x256xf32>,
    return
  }
}

</mosaic_0001>

<bundles_post_ra>
// kernel: evo2_forward.1
= control target key start
LH: loop header
LB: loop body
LE: loop exit
PB: predicated region body
PF: predicated region fallthrough
CT: control target
= control target key end

     0   :  { %11 = vsyncpa [#allocation3], 0  ;;  %s2448_s0 = inlined_call_operand.vmem [shape: s32[32,1], index: 0, kind: input, shape index: {}]   ;;  %s2449_s1 = inlined_call_operand.hbm [shape: bf16[256,128], index: 1, kind: input, shape index: {}]   ;;  %s2450_s2 = inlined_call_operand.hbm [shape: bf16[2,128,384], index: 2, kind: input, shape index: {}]   ;;  %s2451_s3 = inlined_call_operand.vmem [shape: f32[2,4,128], index: 3, kind: input, shape index: {}]   ;;  %s2452_s4 = inlined_call_operand.hbm [shape: bf16[2,128,128], index: 4, kind: input, shape index: {}]   ;;  %s2453_s5 = inlined_call_operand.hbm [shape: bf16[128,256], index: 5, kind: input, shape index: {}]   ;;  %s2454_s6 = inlined_call_operand.hbm [shape: f32[32,256], index: 6, kind: output, shape index: {}]  }
   0x1   :  { %12 = vsyncpa [#allocation6], 0 }
   0x2   :  { %13 = vsyncpa [#allocation9], 0 }
   0x3   :  { %14 = vsyncpa [#allocation4], 0  ;;  %s2102_s21 = smov [#allocation5]   ;;  %s1984_s25 = scalar_lea.hbm %s2450_s2, 6144 }
   0x4   :  { %s34_s22 = sshll.u32 %s2102_s21, 4  ;;  %p1985_p0 = scmp.ne.s32.totalorder %s2450_s2, %s1984_s25  ;;  %s35_s22 = int_to_ptr.vmem [resolvable:$true] %s34_s22 }
   0x5   :  { %p1988_p1 = scmp.lt.u32.totalorder %s1984_s25, %s2450_s2 }
   0x7   :  { %p1990_p2 = pnand %p1988_p1, %p1985_p0 }
   0x9   :  { %1993 = shalt.err (!%p1990_p2)
}
   0xa   :  { %s1994_s30 = scalar_lea.vmem %s35_s22, 6144  ;;  %p1999_p4 = scmp.lt.s32.totalorder %s35_s22, %s35_s22 }
   0xb   :  { %p1995_p3 = scmp.ne.s32.totalorder %s35_s22, %s1994_s30  ;;  %p2000_p5 = scmp.lt.s32.totalorder %s1994_s30, %s1994_s30 }
   0xd   :  { %p2001_p6 = por %p2000_p5, %p1999_p4 }
   0xf   :  { %p2002_p7 = pnand %p2001_p6, %p1995_p3 }
  0x11   :  { %2005 = shalt.err (!%p2002_p7)
}
  0x12   :  { %s2103_s7 = smov 192   ;;  %s2104_s8 = smov 12  }
  0x13   :  { %40 = dma.hbm_to_vmem [thread:$0]  %s2450_s2, 6144, %s35_s22, [#allocation6], %s2103_s7, %s2103_s7, %s2104_s8  }
  0x14   :  { %s2105_s11 = smov [#allocation2]   ;;  %s2006_s15 = scalar_lea.hbm %s2449_s1, 2048 }
  0x15   :  { %s22_s12 = sshll.u32 %s2105_s11, 4  ;;  %p2007_p8 = scmp.ne.s32.totalorder %s2449_s1, %s2006_s15  ;;  %s23_s12 = int_to_ptr.vmem [resolvable:$true] %s22_s12 }
  0x16   :  { %p2010_p9 = scmp.lt.u32.totalorder %s2006_s15, %s2449_s1 }
  0x18   :  { %p2012_p10 = pnand %p2010_p9, %p2007_p8 }
  0x1a   :  { %2015 = shalt.err (!%p2012_p10)
}
  0x1b   :  { %s2016_s20 = scalar_lea.vmem %s23_s12, 2048  ;;  %p2021_p12 = scmp.lt.s32.totalorder %s23_s12, %s23_s12 }
  0x1c   :  { %p2017_p11 = scmp.ne.s32.totalorder %s23_s12, %s2016_s20  ;;  %p2022_p13 = scmp.lt.s32.totalorder %s2016_s20, %s2016_s20 }
  0x1e   :  { %p2023_p0 = por %p2022_p13, %p2021_p12 }
  0x20   :  { %p2024_p1 = pnand %p2023_p0, %p2017_p11 }
  0x22   :  { %2027 = shalt.err (!%p2024_p1)
}
  0x23   :  { %s2106_s2 = smov 64   ;;  %s2107_s21 = smov 4  }
  0x24   :  { %28 = dma.hbm_to_vmem [thread:$0]  %s2449_s1, 2048, %s23_s12, [#allocation3], %s2106_s2, %s2106_s2, %s2107_s21  }
  0x25   :  { %s2108_s24 = smov [#allocation7]   ;;  %s2109_s26 = smov [#allocation8]  }
  0x26   :  { %s48_s25 = sshll.u32 %s2108_s24, 4  ;;  %s60_s27 = sshll.u32 %s2109_s26, 4  ;;  %s49_s25 = int_to_ptr.vmem [resolvable:$true] %s48_s25  ;;  %s2176_s27 = int_to_ptr.vmem [resolvable:$true] %s60_s27 }
  0x27   :  { %s2028_s30 = scalar_lea.hbm %s2452_s4, 2048 }
  0x28   :  { %p2029_p2 = scmp.ne.s32.totalorder %s2452_s4, %s2028_s30  ;;  %p2032_p3 = scmp.lt.u32.totalorder %s2028_s30, %s2452_s4 }
  0x2a   :  { %p2034_p4 = pnand %p2032_p3, %p2029_p2 }
  0x2c   :  { %2037 = shalt.err (!%p2034_p4)
}
  0x2d   :  { %s2038_s1 = scalar_lea.vmem %s49_s25, 2048  ;;  %p2043_p6 = scmp.lt.s32.totalorder %s49_s25, %s49_s25 }
  0x2e   :  { %p2039_p5 = scmp.ne.s32.totalorder %s49_s25, %s2038_s1  ;;  %p2044_p7 = scmp.lt.s32.totalorder %s2038_s1, %s2038_s1 }
  0x30   :  { %p2045_p8 = por %p2044_p7, %p2043_p6 }
  0x32   :  { %p2046_p9 = pnand %p2045_p8, %p2039_p5 }
  0x34   :  { %2049 = shalt.err (!%p2046_p9)
}
  0x35   :  { %54 = dma.hbm_to_vmem [thread:$0]  %s2452_s4, 2048, %s49_s25, [#allocation6], %s2106_s2, %s2106_s2, %s2107_s21  }
  0x36   :  { %s2050_s15 = scalar_lea.hbm %s2453_s5, 2048 }
  0x37   :  { %p2051_p10 = scmp.ne.s32.totalorder %s2453_s5, %s2050_s15  ;;  %p2054_p11 = scmp.lt.u32.totalorder %s2050_s15, %s2453_s5 }
  0x39   :  { %p2056_p12 = pnand %p2054_p11, %p2051_p10 }
  0x3b   :  { %2059 = shalt.err (!%p2056_p12)
}
  0x3c   :  { %s2060_s20 = scalar_lea.vmem %s2176_s27, 2048  ;;  %p2065_p0 = scmp.lt.s32.totalorder %s2176_s27, %s2176_s27 }
  0x3d   :  { %p2061_p13 = scmp.ne.s32.totalorder %s2176_s27, %s2060_s20  ;;  %p2066_p1 = scmp.lt.s32.totalorder %s2060_s20, %s2060_s20 }
  0x3f   :  { %p2067_p2 = por %p2066_p1, %p2065_p0 }
  0x41   :  { %p2068_p3 = pnand %p2067_p2, %p2061_p13 }
  0x43   :  { %2071 = shalt.err (!%p2068_p3)
}
  0x44   :  { %s2110_s4 = smov 128   ;;  %s2111_s2 = smov 8  }
  0x45   :  { %66 = dma.hbm_to_vmem [thread:$0]  %s2453_s5, 2048, %s2176_s27, [#allocation9], %s2110_s4, %s2110_s4, %s2111_s2  }
  0x46   :  { %2094 = dma.done.wait [#allocation3], 2048  }
  0x47   :  { %2095 = vsyncadd [#allocation3], 4294965248 }
  0x48   :  { %2096 = dma.done.wait [#allocation6], 8192  }
  0x49   :  { %2097 = vsyncadd [#allocation6], 4294959104 }
  0x4a   :  { %2098 = dma.done.wait [#allocation9], 2048  }
  0x4b   :  { %2099 = vsyncadd [#allocation9], 4294965248  ;;  %v2112_v0 = vmov 0   ;;  %v80_v1 = vld [vmem:[%s2448_s0] sm:$0xff]  ;;  %v82_v2 = vld [vmem:[%s2448_s0 + $0x10] sm:$0xff]  ;;  %v84_v21 = vlaneseq }
  0x4c   :  { %1838 = vset.pattern.permute.xlu0 %v2112_v0  ;;  %1839 = vset.pattern.permute.xlu1 %v2112_v0  ;;  %v81_v3 = vld [vmem:[%s2448_s0 + $0x8] sm:$0xff]  ;;  %v83_v4 = vld [vmem:[%s2448_s0 + $0x18] sm:$0xff]  ;;  %v1842_v7 = vld [vmem:[#allocation2 + $0x48] sm:$0xff]   ;;  %v2113_v28 = vmov 1.0|1.0  }
  0x4d   :  { %549 = vmatprep.mubr.bf16.mxu1 %v2112_v0  ;;  %88 = vperm.xlu0 %1838, %v80_v1   ;;  %v1840_v5 = vld [vmem:[#allocation2 + $0x40] sm:$0xff]   ;;  %v1843_v8 = vld [vmem:[#allocation2 + $0x8] sm:$0xff]   ;;  %v1844_v9 = vld [vmem:[#allocation2 + $0x50] sm:$0xff]   ;;  %v85_v22 = vand.u32 127, %v84_v21 }
  0x4e   :  { %94 = vperm.xlu1 %1839, %v82_v2   ;;  %v1841_v6 = vld [vmem:[#allocation2] sm:$0xff]   ;;  %1675 = vmatprep.subr.bf16.mxu0 %v1840_v5  ;;  %v1845_v10 = vld [vmem:[#allocation2 + $0x10] sm:$0xff]   ;;  %v1846_v11 = vld [vmem:[#allocation2 + $0x58] sm:$0xff]  }
  0x4f   :  { %1676 = vmatpush3.bf16.msra.mxu0 %v1841_v6  ;;  %v1847_v12 = vld [vmem:[#allocation2 + $0x18] sm:$0xff]   ;;  %v1848_v13 = vld [vmem:[#allocation2 + $0x60] sm:$0xff]   ;;  %v1850_v15 = vld [vmem:[#allocation2 + $0x68] sm:$0xff]   ;;  %v86_v25 = vadd.s32 128, %v85_v22 }
  0x50   :  { %1677 = vmatprep.subr.bf16.mxu0 %v1842_v7  ;;  %v1849_v14 = vld [vmem:[#allocation2 + $0x20] sm:$0xff]   ;;  %v1851_v16 = vld [vmem:[#allocation2 + $0x28] sm:$0xff]   ;;  %v1852_v17 = vld [vmem:[#allocation2 + $0x70] sm:$0xff]  }
  0x51   :  { %91 = vperm.xlu0 %1838, %v81_v3   ;;  %v1853_v18 = vld [vmem:[#allocation2 + $0x30] sm:$0xff]   ;;  %v1854_v19 = vld [vmem:[#allocation2 + $0x78] sm:$0xff]   ;;  %v1858_v30 = vld [vmem:[#allocation5] ss:$12 sps:$4 sm:$0xff]  }
  0x52   :  { %97 = vperm.xlu1 %1839, %v83_v4   ;;  %v1855_v20 = vld [vmem:[#allocation2 + $0x38] sm:$0xff]   ;;  %v1856_v29 = vld [vmem:[#allocation5 + $0x4] ss:$12 sps:$4 sm:$0xff]   ;;  %v1865_v32 = vld [vmem:[#allocation5 + $0x8] ss:$12 sps:$4 sm:$0xff]  }
  0x53   :  { %1678 = vmatpush3.bf16.msra.mxu0 %v1843_v8  ;;  %v1859_v31 = vld [vmem:[#allocation5 + $0x1c] ss:$12 sps:$4 sm:$0xff]   ;;  %517 = vmatprep.subr.bf16.mxu1 %v1856_v29  ;;  %v1861_v33 = vld [vmem:[#allocation5 + $0x18] ss:$12 sps:$4 sm:$0xff]   ;;  %v1862_v34 = vld [vmem:[#allocation5 + $0x34] ss:$12 sps:$4 sm:$0xff]  }
  0x54   :  { %1679 = vmatprep.subr.bf16.mxu0 %v1844_v9  ;;  %518 = vmatpush1.bf16.msra.mxu1 %v1858_v30  ;;  %v1864_v35 = vld [vmem:[#allocation5 + $0x30] ss:$12 sps:$4 sm:$0xff]   ;;  %v1866_v52 = vld [vmem:[#allocation5 + $0x4c] ss:$12 sps:$4 sm:$0xff]   ;;  %v1868_v53 = vld [vmem:[#allocation5 + $0x48] ss:$12 sps:$4 sm:$0xff]  }
  0x55   :  { %519 = vmatprep.subr.bf16.mxu1 %v1859_v31  ;;  %v1869_v54 = vld [vmem:[#allocation5 + $0x20] ss:$12 sps:$4 sm:$0xff]   ;;  %v1870_v55 = vld [vmem:[#allocation5 + $0x64] ss:$12 sps:$4 sm:$0xff]   ;;  %v1874_v58 = vld [vmem:[#allocation5 + $0x7c] ss:$12 sps:$4 sm:$0xff]  }
  0x56   :  { %v1872_v56 = vld [vmem:[#allocation5 + $0x60] ss:$12 sps:$4 sm:$0xff]   ;;  %v1873_v57 = vld [vmem:[#allocation5 + $0x38] ss:$12 sps:$4 sm:$0xff]   ;;  %v1877_v60 = vld [vmem:[#allocation5 + $0x50] ss:$12 sps:$4 sm:$0xff]  }
  0x57   :  { %1680 = vmatpush3.bf16.msra.mxu0 %v1845_v10  ;;  %v1876_v59 = vld [vmem:[#allocation5 + $0x78] ss:$12 sps:$4 sm:$0xff]   ;;  %v1878_v61 = vld [vmem:[#allocation5 + $0x94] ss:$12 sps:$4 sm:$0xff]   ;;  %v1880_v62 = vld [vmem:[#allocation5 + $0x90] ss:$12 sps:$4 sm:$0xff]  }
  0x58   :  { %1681 = vmatprep.subr.bf16.mxu0 %v1846_v11  ;;  %520 = vmatpush1.bf16.msra.mxu1 %v1861_v33  ;;  %v1881_v63 = vld [vmem:[#allocation5 + $0x68] ss:$12 sps:$4 sm:$0xff]   ;;  %v1882_v1 = vld [vmem:[#allocation5 + $0xac] ss:$12 sps:$4 sm:$0xff]   ;;  %v1887_v5 = vld [vmem:[#allocation5 + $0xb0] ss:$12 sps:$4 sm:$0xff]  }
  0x59   :  { %521 = vmatprep.subr.bf16.mxu1 %v1862_v34  ;;  %v1884_v2 = vld [vmem:[#allocation5 + $0xa8] ss:$12 sps:$4 sm:$0xff]   ;;  %v1885_v3 = vld [vmem:[#allocation5 + $0x80] ss:$12 sps:$4 sm:$0xff]   ;;  %v1886_v4 = vld [vmem:[#allocation5 + $0x98] ss:$12 sps:$4 sm:$0xff]  }
  0x5a   :  { %v1888_v29 = vld [vmem:[#allocation7] sm:$0xff]   ;;  %v1889_v30 = vld [vmem:[#allocation7 + $0x8] sm:$0xff]   ;;  %v1890_v31 = vld [vmem:[#allocation7 + $0x10] sm:$0xff]  }
  0x5b   :  { %1682 = vmatpush3.bf16.msra.mxu0 %v1847_v12  ;;  %v1892_v33 = vld [vmem:[#allocation7 + $0x20] sm:$0xff]   ;;  %v1893_v34 = vld [vmem:[#allocation7 + $0x28] sm:$0xff]  }
  0x5c   :  { %1683 = vmatprep.subr.bf16.mxu0 %v1848_v13  ;;  %522 = vmatpush1.bf16.msra.mxu1 %v1864_v35  ;;  %v1894_v35 = vld [vmem:[#allocation7 + $0x30] sm:$0xff]  }
  0x5d   :  { %523 = vmatprep.subr.bf16.mxu1 %v1866_v52 }
  0x5f   :  { %1684 = vmatpush3.bf16.msra.mxu0 %v1849_v14 }
  0x60   :  { %1685 = vmatprep.subr.bf16.mxu0 %v1850_v15  ;;  %524 = vmatpush1.bf16.msra.mxu1 %v1868_v53 }
  0x61   :  { %525 = vmatprep.subr.bf16.mxu1 %v1870_v55 }
  0x63   :  { %1686 = vmatpush3.bf16.msra.mxu0 %v1851_v16 }
  0x64   :  { %1687 = vmatprep.subr.bf16.mxu0 %v1852_v17  ;;  %526 = vmatpush1.bf16.msra.mxu1 %v1872_v56 }
  0x65   :  { %527 = vmatprep.subr.bf16.mxu1 %v1874_v58 }
  0x67   :  { %1688 = vmatpush3.bf16.msra.mxu0 %v1853_v18 }
  0x68   :  { %1689 = vmatprep.subr.bf16.mxu0 %v1854_v19  ;;  %528 = vmatpush1.bf16.msra.mxu1 %v1876_v59 }
  0x69   :  { %529 = vmatprep.subr.bf16.mxu1 %v1878_v61 }
  0x6b   :  { %1690 = vmatpush3.bf16.msra.mxu0 %v1855_v20 }
  0x6c   :  { %1743 = vmatprep.subr.bf16.mxu0 %v1865_v32  ;;  %530 = vmatpush1.bf16.msra.mxu1 %v1880_v62 }
  0x6d   :  { %531 = vmatprep.subr.bf16.mxu1 %v1882_v1 }
  0x70   :  { %532 = vmatpush1.bf16.msra.mxu1 %v1884_v2 }
  0x71   :  { %1763 = vmatprep.subr.bf16.mxu1 %v1888_v29 }
  0xcc   :  { %v89_v23 = vpop.permute.xlu0 %88 }
  0xcd   :  { %v95_v24 = vpop.permute.xlu1 %94  ;;  %vm99_vm0 = vcmp.eq.s32.totalorder %v85_v22, %v89_v23  ;;  %vm100_vm6 = vcmp.eq.s32.totalorder %v86_v25, %v89_v23 }
  0xce   :  { %vm104_vm1 = vcmp.eq.s32.totalorder %v86_v25, %v95_v24  ;;  %vm103_vm9 = vcmp.eq.s32.totalorder %v85_v22, %v95_v24 }
  0xd0   :  { %v92_v26 = vpop.permute.xlu0 %91 }
  0xd1   :  { %v98_v27 = vpop.permute.xlu1 %97  ;;  %vm101_vm2 = vcmp.eq.s32.totalorder %v85_v22, %v92_v26  ;;  %vm102_vm3 = vcmp.eq.s32.totalorder %v86_v25, %v92_v26 }
  0xd2   :  { %vm106_vm4 = vcmp.eq.s32.totalorder %v86_v25, %v98_v27  ;;  %vm1588_vm5 = vmpackc.low %vm101_vm2, %vm99_vm0  ;;  %vm105_vm10 = vcmp.eq.s32.totalorder %v85_v22, %v98_v27 }
  0xd3   :  { %vm1586_vm7 = vmpackc.low %vm102_vm3, %vm100_vm6 }
  0xd4   :  { %1587 = vmatprep.mubr.msk.bf16.mxu0 %vm1586_vm7, %v2113_v28  ;;  %vm1590_vm8 = vmpackc.low %vm106_vm4, %vm104_vm1 }
  0xd5   :  { %1589 = vmatmul.mubr.msk.bf16.vlgmr.msra.gmra.mrb[0].mxu0 %vm1588_vm5, %v2113_v28  ;;  %vm1592_vm11 = vmpackc.low %vm105_vm10, %vm103_vm9 }
  0xd6   :  { %1591 = vmatprep.mubr.msk.bf16.mxu0 %vm1590_vm8, %v2113_v28  ;;  %1744 = vmatpush3.bf16.msra.mxu0 %v1865_v32  ;;  %v1891_v32 = vld [vmem:[#allocation7 + $0x18] sm:$0xff]  }
  0xd7   :  { %1745 = vmatprep.subr.bf16.mxu0 %v1869_v54 }
  0xda   :  { %1746 = vmatpush3.bf16.msra.mxu0 %v1869_v54 }
  0xdb   :  { %1747 = vmatprep.subr.bf16.mxu0 %v1873_v57 }
  0xdd   :  { %1593 = vmatmul.mubr.msk.bf16.gmra.mrb[4].mxu0 %vm1592_vm11, %v2113_v28 }
  0xde   :  { %1748 = vmatpush3.bf16.msra.mxu0 %v1873_v57 }
  0xdf   :  { %1749 = vmatprep.subr.bf16.mxu0 %v1877_v60 }
  0xe2   :  { %1750 = vmatpush3.bf16.msra.mxu0 %v1877_v60 }
  0xe3   :  { %1751 = vmatprep.subr.bf16.mxu0 %v1881_v63 }
  0xe6   :  { %1752 = vmatpush3.bf16.msra.mxu0 %v1881_v63 }
  0xe7   :  { %1753 = vmatprep.subr.bf16.mxu0 %v1885_v3 }
  0xea   :  { %1754 = vmatpush3.bf16.msra.mxu0 %v1885_v3 }
  0xeb   :  { %1755 = vmatprep.subr.bf16.mxu0 %v1886_v4 }
  0xee   :  { %1756 = vmatpush3.bf16.msra.mxu0 %v1886_v4 }
  0xef   :  { %1757 = vmatprep.subr.bf16.mxu0 %v1887_v5 }
  0xf2   :  { %1758 = vmatpush3.bf16.msra.mxu0 %v1887_v5 }
 0x1a8   :  { %v1691_v36 = vpop.f32.mrb[0].mxu0 }
 0x1a9   :  { %v1692_v37 = vpop.f32.mrb[1].mxu0 }
 0x1aa   :  { %v2223_v38 = vadd.f32 %v1692_v37, %v1691_v36  ;;  %v1694_v39 = vpop.f32.mrb[2].mxu0  ;;  %v1895_v36 = vld [vmem:[#allocation7 + $0x38] sm:$0xff]   ;;  %v2246_v37 = vshrl.u32 %v84_v21, 7 }
 0x1ab   :  { %v1695_v40 = vpop.f32.mrb[3].mxu0 }
 0x1ac   :  { %v2225_v41 = vadd.f32 %v1695_v40, %v1694_v39  ;;  %v326_v42 = vmul.f32 %v2223_v38, %v2223_v38  ;;  %v650_v39 = vsub.s32 1, %v2246_v37  ;;  %vm631_vm12 = vcmp.lt.s32.totalorder %v2246_v37, 1 }
 0x1ad   :  { %vm664_vm13 = vcmp.lt.s32.totalorder %v2246_v37, 2  ;;  %vm697_vm14 = vcmp.lt.s32.totalorder %v2246_v37, 3  ;;  %v2292_v4 = vand.u32 15, %v2246_v37 }
 0x1ae   :  { %330 = vadd.xlane.f32.xlu0 %v326_v42  ;;  %v327_v43 = vmul.f32 %v2225_v41, %v2225_v41  ;;  %v325_v42 = vld [vmem:[%s2451_s3] sm:$0xf] }
 0x1af   :  { %v2263_v21 = vrot.slane %v325_v42, %v650_v39  ;;  %vm313_vm2 = vcmp.ge.s32.totalorder %v2292_v4, 1  ;;  %vm317_vm3 = vcmp.ge.s32.totalorder %v2292_v4, 2  ;;  %vm321_vm4 = vcmp.ge.s32.totalorder %v2292_v4, 3 }
 0x1b0   :  { %v1697_v44 = vpop.f32.mrb[4].mxu0  ;;  %332 = vadd.xlane.f32.xlu1 %v327_v43 }
 0x1b1   :  { %v1698_v45 = vpop.f32.mrb[5].mxu0 }
 0x1b2   :  { %v2231_v46 = vadd.f32 %v1698_v45, %v1697_v44  ;;  %v1700_v47 = vpop.f32.mrb[6].mxu0  ;;  %v621_v44 = vsub.s32 0, %v2246_v37  ;;  %v683_v45 = vsub.s32 2, %v2246_v37 }
 0x1b3   :  { %v1701_v48 = vpop.f32.mrb[7].mxu0 }
 0x1b4   :  { %v2233_v49 = vadd.f32 %v1701_v48, %v1700_v47  ;;  %v328_v50 = vmul.f32 %v2231_v46, %v2231_v46  ;;  %v307_v48 = vadd.s32 16, %v2246_v37  ;;  %v622_v58 = vrot.slane %v325_v42, %v621_v44 }
 0x1b5   :  { %v684_v59 = vrot.slane %v325_v42, %v683_v45 }
 0x1b6   :  { %334 = vadd.xlane.f32.xlu0 %v328_v50  ;;  %v329_v51 = vmul.f32 %v2233_v49, %v2233_v49  ;;  %v716_v50 = vsub.s32 3, %v2246_v37  ;;  %v2278_v61 = vand.u32 15, %v307_v48 }
 0x1b8   :  { %v717_v3 = vrot.slane %v325_v42, %v716_v50  ;;  %vm315_vm15 = vcmp.ge.s32.totalorder %v2278_v61, 1  ;;  %vm319_vm0 = vcmp.ge.s32.totalorder %v2278_v61, 2  ;;  %vm323_vm1 = vcmp.ge.s32.totalorder %v2278_v61, 3 }
 0x1ba   :  { %336 = vadd.xlane.f32.xlu0 %v329_v51 }
 0x23b   :  { %v331_v6 = vpop.xlane.xlu0 %330 }
 0x23c   :  { %v339_v7 = vmul.f32 0.0078125, %v331_v6 }
 0x23d   :  { %v333_v8 = vpop.xlane.xlu1 %332 }
 0x23e   :  { %v343_v9 = vadd.f32 1e-05, %v339_v7  ;;  %v340_v10 = vmul.f32 0.0078125, %v333_v8 }
 0x240   :  { %1960 = vrsqrt.f32 %v343_v9  ;;  %v344_v11 = vadd.f32 1e-05, %v340_v10 }
 0x242   :  { %1962 = vrsqrt.f32 %v344_v11 }
 0x243   :  { %v335_v12 = vpop.xlane.xlu0 %334 }
 0x244   :  { %v341_v13 = vmul.f32 0.0078125, %v335_v12 }
 0x246   :  { %v345_v14 = vadd.f32 1e-05, %v341_v13 }
 0x247   :  { %v337_v15 = vpop.xlane.xlu0 %336 }
 0x248   :  { %v342_v16 = vmul.f32 0.0078125, %v337_v15  ;;  %1964 = vrsqrt.f32 %v345_v14 }
 0x24a   :  { %v1961_v17 = vpop.eup %1960  ;;  %v346_v18 = vadd.f32 1e-05, %v342_v16 }
 0x24b   :  { %v351_v20 = vmul.f32 %v1961_v17, %v2223_v38 }
 0x24c   :  { %v1963_v19 = vpop.eup %1962  ;;  %1966 = vrsqrt.f32 %v346_v18 }
 0x24d   :  { %v352_v22 = vmul.f32 %v1963_v19, %v2225_v41 }
 0x24f   :  { %v355_v23 = vpack.c.bf16 %v352_v22, %v351_v20 }
 0x251   :  { %550 = vmatmul.mubr.bf16.vlgmr.msra.gmra.mrb[0].mxu1 %v355_v23  ;;  %1759 = vmatprep.mubr.bf16.mxu0 %v355_v23 }
 0x252   :  { %559 = vmatprep.mubr.bf16.mxu1 %v2112_v0  ;;  %v1965_v24 = vpop.eup %1964  ;;  %1764 = vmatpush3.bf16.msra.mxu1 %v1888_v29 }
 0x253   :  { %v353_v26 = vmul.f32 %v1965_v24, %v2231_v46  ;;  %1765 = vmatprep.subr.bf16.mxu1 %v1889_v30 }
 0x256   :  { %v1967_v25 = vpop.eup %1966  ;;  %1766 = vmatpush3.bf16.msra.mxu1 %v1889_v30 }
 0x257   :  { %v354_v27 = vmul.f32 %v1967_v25, %v2233_v49  ;;  %1767 = vmatprep.subr.bf16.mxu1 %v1890_v31 }
 0x259   :  { %v356_v28 = vpack.c.bf16 %v354_v27, %v353_v26 }
 0x25a   :  { %1768 = vmatpush3.bf16.msra.mxu1 %v1890_v31 }
 0x25b   :  { %560 = vmatmul.mubr.bf16.gmra.mrb[4].mxu1 %v356_v28  ;;  %1760 = vmatmul.mubr.bf16.vlgmr.msra.gmra.mrb[8].mxu0 %v356_v28 }
 0x25c   :  { %1078 = vmatprep.mubr.bf16.mxu0 %v2112_v0  ;;  %1769 = vmatprep.subr.bf16.mxu1 %v1891_v32 }
 0x25e   :  { %1770 = vmatpush3.bf16.msra.mxu1 %v1891_v32 }
 0x25f   :  { %1771 = vmatprep.subr.bf16.mxu1 %v1892_v33 }
 0x262   :  { %1772 = vmatpush3.bf16.msra.mxu1 %v1892_v33 }
 0x263   :  { %1773 = vmatprep.subr.bf16.mxu1 %v1893_v34 }
 0x266   :  { %1774 = vmatpush3.bf16.msra.mxu1 %v1893_v34 }
 0x267   :  { %1775 = vmatprep.subr.bf16.mxu1 %v1894_v35 }
 0x26a   :  { %1776 = vmatpush3.bf16.msra.mxu1 %v1894_v35 }
 0x26b   :  { %1777 = vmatprep.subr.bf16.mxu1 %v1895_v36 }
 0x26e   :  { %1778 = vmatpush3.bf16.msra.mxu1 %v1895_v36 }
 0x324   :  { %v2249_v40 = vpop.f32.mrb[0].mxu1 }
 0x325   :  { %v2254_v43 = vpop.f32.mrb[1].mxu1 }
 0x326   :  { %v2258_v47 = vpop.f32.mrb[2].mxu1  ;;  %v627_v51 = vrot.slane %v2254_v43, 7  ;;  %v660_v52 = vrot.slane %v2254_v43, 6  ;;  %v693_v54 = vrot.slane %v2254_v43, 5  ;;  %v623_v18 = vmul.f32 %v622_v58, %v2254_v43 }
 0x327   :  { %v557_v53 = vpop.f32.mrb[3].mxu1 }
 0x328   :  { %v628_v55 = vrot.slane %v557_v53, 7  ;;  %v661_v56 = vrot.slane %v557_v53, 6  ;;  %v694_v57 = vrot.slane %v557_v53, 5  ;;  %v624_v1 = vmul.f32 %v622_v58, %v557_v53 }
 0x32a   :  { %v634_v60 = vsel %vm631_vm12, %v627_v51, %v628_v55  ;;  %v667_v62 = vsel %vm664_vm13, %v660_v52, %v661_v56  ;;  %v700_v63 = vsel %vm697_vm14, %v693_v54, %v694_v57 }
 0x32b   :  { %v653_v2 = vmul.f32 %v2263_v21, %v634_v60  ;;  %v686_v6 = vmul.f32 %v684_v59, %v667_v62  ;;  %v719_v12 = vmul.f32 %v717_v3, %v700_v63 }
 0x32d   :  { %v657_v5 = vadd.f32 %v653_v2, %v624_v1 }
 0x32e   :  { %v561_v7 = vpop.f32.mrb[4].mxu1  ;;  %v1761_v8 = vpop.f32.mrb[8].mxu0 }
 0x32f   :  { %v563_v9 = vpop.f32.mrb[5].mxu1  ;;  %v604_v10 = vpop.f32.mrb[9].mxu0  ;;  %v690_v11 = vadd.f32 %v686_v6, %v657_v5 }
 0x330   :  { %v629_v13 = vrot.slane %v563_v9, 7  ;;  %v662_v14 = vrot.slane %v563_v9, 6  ;;  %v695_v15 = vrot.slane %v563_v9, 5  ;;  %v565_v16 = vpop.f32.mrb[6].mxu1  ;;  %v1762_v17 = vpop.f32.mrb[10].mxu0  ;;  %v625_v19 = vmul.f32 %v622_v58, %v563_v9 }
 0x331   :  { %v567_v20 = vpop.f32.mrb[7].mxu1  ;;  %v607_v22 = vpop.f32.mrb[11].mxu0  ;;  %v723_v23 = vadd.f32 %v719_v12, %v690_v11 }
 0x332   :  { %v633_v24 = vsel %vm631_vm12, %v628_v55, %v629_v13  ;;  %v666_v25 = vsel %vm664_vm13, %v661_v56, %v662_v14  ;;  %v699_v26 = vsel %vm697_vm14, %v694_v57, %v695_v15  ;;  %v626_v27 = vmul.f32 %v622_v58, %v567_v20 }
 0x333   :  { %v646_v28 = vsel %vm315_vm15, %v633_v24, 0.0  ;;  %v679_v29 = vsel %vm319_vm0, %v666_v25, 0.0  ;;  %v712_v30 = vsel %vm323_vm1, %v699_v26, 0.0  ;;  %v630_v31 = vrot.slane %v567_v20, 7 }
 0x334   :  { %v654_v32 = vmul.f32 %v2263_v21, %v646_v28  ;;  %v687_v33 = vmul.f32 %v684_v59, %v679_v29  ;;  %v720_v34 = vmul.f32 %v717_v3, %v712_v30  ;;  %v663_v35 = vrot.slane %v567_v20, 6  ;;  %v1898_v28 = vld [vmem:[#allocation5 + $0xc4] ss:$12 sps:$4 sm:$0xff]   ;;  %v1901_v29 = vld [vmem:[#allocation5 + $0xdc] ss:$12 sps:$4 sm:$0xff]  }
 0x335   :  { %v632_v36 = vsel %vm631_vm12, %v629_v13, %v630_v31  ;;  %v635_v42 = vsel %vm631_vm12, %v630_v31, %v627_v51  ;;  %v696_v48 = vrot.slane %v567_v20, 5  ;;  %v727_v53 = vmul.f32 %v723_v23, %v2258_v47  ;;  %v1902_v30 = vld [vmem:[#allocation5 + $0xc8] ss:$12 sps:$4 sm:$0xff]   ;;  %1046 = vmatprep.subr.bf16.mxu0 %v1898_v28 }
 0x336   :  { %v658_v55 = vadd.f32 %v654_v32, %v625_v19  ;;  %v644_v56 = vsel %vm313_vm2, %v635_v42, 0.0  ;;  %v655_v57 = vmul.f32 %v2263_v21, %v632_v36  ;;  %v665_v58 = vsel %vm664_vm13, %v662_v14, %v663_v35  ;;  %1783 = vmatprep.subr.bf16.mxu1 %v1902_v30  ;;  %v1910_v42 = vld [vmem:[#allocation5 + $0xf8] ss:$12 sps:$4 sm:$0xff]  }
 0x337   :  { %v652_v60 = vmul.f32 %v2263_v21, %v644_v56  ;;  %v668_v62 = vsel %vm664_vm13, %v663_v35, %v660_v52  ;;  %v688_v51 = vmul.f32 %v684_v59, %v665_v58  ;;  %v698_v47 = vsel %vm697_vm14, %v695_v15, %v696_v48  ;;  %v1915_v56 = vld [vmem:[#allocation5 + $0x138] ss:$12 sps:$4 sm:$0xff]   ;;  %v1918_v58 = vld [vmem:[#allocation5 + $0x128] ss:$12 sps:$4 sm:$0xff]  }
 0x338   :  { %v691_v63 = vadd.f32 %v687_v33, %v658_v55  ;;  %v659_v1 = vadd.f32 %v655_v57, %v626_v27  ;;  %v677_v2 = vsel %vm317_vm3, %v668_v62, 0.0  ;;  %v701_v5 = vsel %vm697_vm14, %v696_v48, %v693_v54  ;;  %v1907_v48 = vld [vmem:[#allocation5 + $0x108] ss:$12 sps:$4 sm:$0xff]   ;;  %v1911_v55 = vld [vmem:[#allocation5 + $0x120] ss:$12 sps:$4 sm:$0xff]  }
 0x339   :  { %v685_v21 = vmul.f32 %v684_v59, %v677_v2  ;;  %v710_v6 = vsel %vm321_vm4, %v701_v5, 0.0  ;;  %v656_v9 = vadd.f32 %v652_v60, %v623_v18  ;;  %v721_v12 = vmul.f32 %v717_v3, %v698_v47  ;;  %v1896_v18 = vld [vmem:[#allocation5 + $0xc0] ss:$12 sps:$4 sm:$0xff]   ;;  %v1917_v57 = vld [vmem:[#allocation5 + $0x13c] ss:$12 sps:$4 sm:$0xff]  }
 0x33a   :  { %v724_v52 = vadd.f32 %v720_v34, %v691_v63  ;;  %v692_v11 = vadd.f32 %v688_v51, %v659_v1  ;;  %v731_v13 = vmul.f32 %v727_v53, %v607_v22  ;;  %v718_v15 = vmul.f32 %v717_v3, %v710_v6  ;;  %v1906_v22 = vld [vmem:[#allocation5 + $0xe0] ss:$12 sps:$4 sm:$0xff]   ;;  %1047 = vmatpush1.bf16.msra.mxu0 %v1896_v18  ;;  %v1899_v3 = vld [vmem:[#allocation5 + $0xd8] ss:$12 sps:$4 sm:$0xff]   ;;  %v1914_v53 = vld [vmem:[#allocation5 + $0x110] ss:$12 sps:$4 sm:$0xff]  }
 0x33b   :  { %v689_v14 = vadd.f32 %v685_v21, %v656_v9  ;;  %1048 = vmatprep.subr.bf16.mxu0 %v1901_v29  ;;  %v1921_v60 = vld [vmem:[#allocation5 + $0x154] ss:$12 sps:$4 sm:$0xff]   ;;  %v1919_v51 = vld [vmem:[#allocation5 + $0x150] ss:$12 sps:$4 sm:$0xff]   ;;  %v1925_v47 = vld [vmem:[#allocation5 + $0x16c] ss:$12 sps:$4 sm:$0xff]  }
 0x33c   :  { %v728_v19 = vmul.f32 %v724_v52, %v561_v7  ;;  %v725_v20 = vadd.f32 %v721_v12, %v692_v11  ;;  %v1905_v7 = vld [vmem:[#allocation5 + $0xf4] ss:$12 sps:$4 sm:$0xff]   ;;  %v1926_v63 = vld [vmem:[#allocation5 + $0x158] ss:$12 sps:$4 sm:$0xff]   ;;  %v1927_v2 = vld [vmem:[#allocation5 + $0x170] ss:$12 sps:$4 sm:$0xff]  }
 0x33d   :  { %v722_v23 = vadd.f32 %v718_v15, %v689_v14  ;;  %v1922_v62 = vld [vmem:[#allocation5 + $0x140] ss:$12 sps:$4 sm:$0xff]   ;;  %v1923_v1 = vld [vmem:[#allocation5 + $0x168] ss:$12 sps:$4 sm:$0xff]  }
 0x33e   :  { %v729_v24 = vmul.f32 %v725_v20, %v565_v16  ;;  %v732_v25 = vmul.f32 %v1761_v8, %v728_v19  ;;  %1049 = vmatpush1.bf16.msra.mxu0 %v1899_v3  ;;  %v1928_v5 = vld [vmem:[#allocation7 + $0x40] sm:$0xff]   ;;  %v1931_v3 = vld [vmem:[#allocation7 + $0x58] sm:$0xff]  }
 0x33f   :  { %v726_v43 = vmul.f32 %v722_v23, %v2249_v40  ;;  %v1903_v40 = vld [vmem:[#allocation5 + $0xf0] ss:$12 sps:$4 sm:$0xff]   ;;  %1050 = vmatprep.subr.bf16.mxu0 %v1905_v7  ;;  %v1932_v7 = vld [vmem:[#allocation7 + $0x60] sm:$0xff]  }
 0x340   :  { %v733_v26 = vmul.f32 %v1762_v17, %v729_v24 }
 0x341   :  { %v730_v54 = vmul.f32 %v726_v43, %v604_v10 }
 0x342   :  { %v735_v59 = vpack.c.bf16 %v733_v26, %v732_v25  ;;  %1051 = vmatpush1.bf16.msra.mxu0 %v1903_v40  ;;  %v1933_v40 = vld [vmem:[#allocation7 + $0x68] sm:$0xff]  }
 0x343   :  { %v734_v27 = vpack.c.bf16 %v731_v13, %v730_v54 }
 0x345   :  { %1779 = vmatprep.mubr.bf16.mxu1 %v734_v27 }
 0x346   :  { %1780 = vmatmul.mubr.bf16.vlgmr.msra.gmra.mrb[8].mxu1 %v735_v59 }
 0x347   :  { %1784 = vmatpush3.bf16.msra.mxu1 %v1902_v30  ;;  %v1929_v30 = vld [vmem:[#allocation7 + $0x48] sm:$0xff]  }
 0x348   :  { %1785 = vmatprep.subr.bf16.mxu1 %v1906_v22 }
 0x34b   :  { %1786 = vmatpush3.bf16.msra.mxu1 %v1906_v22  ;;  %v1930_v22 = vld [vmem:[#allocation7 + $0x50] sm:$0xff]  }
 0x34c   :  { %1787 = vmatprep.subr.bf16.mxu1 %v1910_v42 }
 0x34f   :  { %1788 = vmatpush3.bf16.msra.mxu1 %v1910_v42 }
 0x350   :  { %1789 = vmatprep.subr.bf16.mxu1 %v1914_v53 }
 0x353   :  { %1790 = vmatpush3.bf16.msra.mxu1 %v1914_v53 }
 0x354   :  { %1791 = vmatprep.subr.bf16.mxu1 %v1918_v58 }
 0x357   :  { %1792 = vmatpush3.bf16.msra.mxu1 %v1918_v58 }
 0x358   :  { %1793 = vmatprep.subr.bf16.mxu1 %v1922_v62 }
 0x35b   :  { %1794 = vmatpush3.bf16.msra.mxu1 %v1922_v62 }
 0x35c   :  { %1795 = vmatprep.subr.bf16.mxu1 %v1926_v63 }
 0x35f   :  { %1796 = vmatpush3.bf16.msra.mxu1 %v1926_v63 }
 0x360   :  { %1797 = vmatprep.subr.bf16.mxu1 %v1927_v2 }
 0x363   :  { %1798 = vmatpush3.bf16.msra.mxu1 %v1927_v2 }
 0x419   :  { %v1781_v8 = vpop.f32.mrb[8].mxu1 }
 0x41a   :  { %v834_v10 = vpop.f32.mrb[9].mxu1  ;;  %v2344_v32 = vadd.f32 %v1781_v8, %v2231_v46  ;;  %v1934_v8 = vld [vmem:[#allocation7 + $0x70] sm:$0xff]  }
 0x41b   :  { %v2341_v16 = vadd.f32 %v2223_v38, %v834_v10  ;;  %v1782_v17 = vpop.f32.mrb[10].mxu1  ;;  %v1935_v10 = vld [vmem:[#allocation7 + $0x78] sm:$0xff]  }
 0x41c   :  { %v837_v31 = vpop.f32.mrb[11].mxu1  ;;  %v2352_v35 = vadd.f32 %v1782_v17, %v2233_v49  ;;  %v857_v38 = vmul.f32 %v2344_v32, %v2344_v32  ;;  %v1913_v49 = vld [vmem:[#allocation5 + $0x124] ss:$12 sps:$4 sm:$0xff]  }
 0x41d   :  { %v2347_v33 = vadd.f32 %v2225_v41, %v837_v31  ;;  %v855_v34 = vmul.f32 %v2341_v16, %v2341_v16  ;;  %v1909_v41 = vld [vmem:[#allocation5 + $0x10c] ss:$12 sps:$4 sm:$0xff]  }
 0x41e   :  { %v858_v46 = vmul.f32 %v2352_v35, %v2352_v35  ;;  %1052 = vmatprep.subr.bf16.mxu0 %v1909_v41 }
 0x41f   :  { %859 = vadd.xlane.f32.xlu1 %v855_v34  ;;  %v856_v36 = vmul.f32 %v2347_v33, %v2347_v33  ;;  %1053 = vmatpush1.bf16.msra.mxu0 %v1907_v48  ;;  %v1626_v34 = vld [vmem:[%s2451_s3 + $0x4] sm:$0xf]  ;;  %s2114_s3 = smov [#allocation10]  }
 0x420   :  { %1054 = vmatprep.subr.bf16.mxu0 %v1913_v49  ;;  %v1171_v42 = vrot.slane %v1626_v34, %v650_v39  ;;  %s1548_s9 = sshll.u32 %s2114_s3, 4  ;;  %s1549_s9 = int_to_ptr.vmem [resolvable:$true] %s1548_s9 }
 0x421   :  { %861 = vadd.xlane.f32.xlu0 %v856_v36  ;;  %s2072_s10 = scalar_lea.vmem %s1549_s9, 1024  ;;  %p2077_p5 = scmp.lt.s32.totalorder %s1549_s9, %s1549_s9 }
 0x422   :  { %p2073_p4 = scmp.ne.s32.totalorder %s1549_s9, %s2072_s10  ;;  %p2078_p6 = scmp.lt.s32.totalorder %s2072_s10, %s2072_s10 }
 0x423   :  { %863 = vadd.xlane.f32.xlu1 %v857_v38  ;;  %1055 = vmatpush1.bf16.msra.mxu0 %v1911_v55 }
 0x424   :  { %1056 = vmatprep.subr.bf16.mxu0 %v1917_v57  ;;  %v1151_v57 = vrot.slane %v1626_v34, %v621_v44  ;;  %v1219_v44 = vrot.slane %v1626_v34, %v716_v50  ;;  %p2079_p7 = por %p2078_p6, %p2077_p5 }
 0x425   :  { %865 = vadd.xlane.f32.xlu0 %v858_v46 }
 0x426   :  { %p2080_p8 = pnand %p2079_p7, %p2073_p4 }
 0x427   :  { %1057 = vmatpush1.bf16.msra.mxu0 %v1915_v56 }
 0x428   :  { %1058 = vmatprep.subr.bf16.mxu0 %v1921_v60  ;;  %v1195_v60 = vrot.slane %v1626_v34, %v683_v45 }
 0x42b   :  { %1059 = vmatpush1.bf16.msra.mxu0 %v1919_v51 }
 0x42c   :  { %1060 = vmatprep.subr.bf16.mxu0 %v1925_v47 }
 0x42f   :  { %1061 = vmatpush1.bf16.msra.mxu0 %v1923_v1 }
 0x430   :  { %1803 = vmatprep.subr.bf16.mxu0 %v1928_v5 }
 0x4ac   :  { %v860_v21 = vpop.xlane.xlu1 %859 }
 0x4ad   :  { %v867_v6 = vmul.f32 0.0078125, %v860_v21 }
 0x4ae   :  { %v862_v9 = vpop.xlane.xlu0 %861 }
 0x4af   :  { %v871_v52 = vadd.f32 1e-05, %v867_v6  ;;  %v868_v11 = vmul.f32 0.0078125, %v862_v9 }
 0x4b0   :  { %v864_v12 = vpop.xlane.xlu1 %863 }
 0x4b1   :  { %1968 = vrsqrt.f32 %v871_v52  ;;  %v872_v13 = vadd.f32 1e-05, %v868_v11  ;;  %v869_v14 = vmul.f32 0.0078125, %v864_v12 }
 0x4b2   :  { %v866_v15 = vpop.xlane.xlu0 %865 }
 0x4b3   :  { %1970 = vrsqrt.f32 %v872_v13  ;;  %v873_v19 = vadd.f32 1e-05, %v869_v14  ;;  %v870_v20 = vmul.f32 0.0078125, %v866_v15 }
 0x4b5   :  { %1972 = vrsqrt.f32 %v873_v19  ;;  %v874_v23 = vadd.f32 1e-05, %v870_v20 }
 0x4b7   :  { %1974 = vrsqrt.f32 %v874_v23 }
 0x4bb   :  { %v1969_v24 = vpop.eup %1968 }
 0x4bc   :  { %v879_v43 = vmul.f32 %v1969_v24, %v2341_v16 }
 0x4bd   :  { %v1971_v25 = vpop.eup %1970 }
 0x4be   :  { %v880_v26 = vmul.f32 %v1971_v25, %v2347_v33 }
 0x4bf   :  { %v1973_v54 = vpop.eup %1972 }
 0x4c0   :  { %v883_v59 = vpack.c.bf16 %v880_v26, %v879_v43  ;;  %v881_v18 = vmul.f32 %v1973_v54, %v2344_v32 }
 0x4c1   :  { %v1975_v27 = vpop.eup %1974 }
 0x4c2   :  { %1079 = vmatmul.mubr.bf16.vlgmr.msra.gmra.mrb[12].mxu0 %v883_v59  ;;  %1799 = vmatprep.mubr.bf16.mxu1 %v883_v59  ;;  %v882_v28 = vmul.f32 %v1975_v27, %v2352_v35 }
 0x4c3   :  { %1088 = vmatprep.mubr.bf16.mxu0 %v2112_v0  ;;  %1804 = vmatpush3.bf16.msra.mxu0 %v1928_v5 }
 0x4c4   :  { %v884_v29 = vpack.c.bf16 %v882_v28, %v881_v18  ;;  %1805 = vmatprep.subr.bf16.mxu0 %v1929_v30 }
 0x4c6   :  { %1800 = vmatmul.mubr.bf16.vlgmr.msra.gmra.mrb[12].mxu1 %v884_v29 }
 0x4c7   :  { %1514 = vmatprep.mubr.bf16.mxu1 %v2112_v0  ;;  %1806 = vmatpush3.bf16.msra.mxu0 %v1929_v30 }
 0x4c8   :  { %1807 = vmatprep.subr.bf16.mxu0 %v1930_v22 }
 0x4ca   :  { %1089 = vmatmul.mubr.bf16.gmra.mrb[16].mxu0 %v884_v29 }
 0x4cb   :  { %1808 = vmatpush3.bf16.msra.mxu0 %v1930_v22 }
 0x4cc   :  { %1809 = vmatprep.subr.bf16.mxu0 %v1931_v3 }
 0x4cf   :  { %1810 = vmatpush3.bf16.msra.mxu0 %v1931_v3 }
 0x4d0   :  { %1811 = vmatprep.subr.bf16.mxu0 %v1932_v7 }
 0x4d3   :  { %1812 = vmatpush3.bf16.msra.mxu0 %v1932_v7 }
 0x4d4   :  { %1813 = vmatprep.subr.bf16.mxu0 %v1933_v40 }
 0x4d7   :  { %1814 = vmatpush3.bf16.msra.mxu0 %v1933_v40 }
 0x4d8   :  { %1815 = vmatprep.subr.bf16.mxu0 %v1934_v8 }
 0x4db   :  { %1816 = vmatpush3.bf16.msra.mxu0 %v1934_v8 }
 0x4dc   :  { %1817 = vmatprep.subr.bf16.mxu0 %v1935_v10 }
 0x4df   :  { %1818 = vmatpush3.bf16.msra.mxu0 %v1935_v10 }
 0x595   :  { %v2366_v17 = vpop.f32.mrb[12].mxu0 }
 0x596   :  { %v2368_v31 = vpop.f32.mrb[13].mxu0 }
 0x597   :  { %v1084_v36 = vpop.f32.mrb[14].mxu0  ;;  %v1156_v38 = vrot.slane %v2368_v31, 7  ;;  %v1180_v46 = vrot.slane %v2368_v31, 6  ;;  %v1204_v48 = vrot.slane %v2368_v31, 5  ;;  %v1152_v19 = vmul.f32 %v1151_v57, %v2368_v31 }
 0x598   :  { %v1086_v41 = vpop.f32.mrb[15].mxu0 }
 0x599   :  { %v1157_v49 = vrot.slane %v1086_v41, 7  ;;  %v1181_v53 = vrot.slane %v1086_v41, 6  ;;  %v1205_v55 = vrot.slane %v1086_v41, 5  ;;  %v2378_v56 = vpop.f32.mrb[12].mxu1  ;;  %v1153_v63 = vmul.f32 %v1151_v57, %v1086_v41 }
 0x59a   :  { %v2382_v58 = vpop.f32.mrb[13].mxu1 }
 0x59b   :  { %v1162_v62 = vsel %vm631_vm12, %v1156_v38, %v1157_v49  ;;  %v2388_v51 = vpop.f32.mrb[14].mxu1  ;;  %v1186_v39 = vsel %vm664_vm13, %v1180_v46, %v1181_v53  ;;  %v1210_v47 = vsel %vm697_vm14, %v1204_v48, %v1205_v55 }
 0x59c   :  { %v1173_v1 = vmul.f32 %v1171_v42, %v1162_v62  ;;  %v1136_v2 = vpop.f32.mrb[15].mxu1  ;;  %v1197_v45 = vmul.f32 %v1195_v60, %v1186_v39  ;;  %v1221_v14 = vmul.f32 %v1219_v44, %v1210_v47 }
 0x59d   :  { %v1090_v5 = vpop.f32.mrb[16].mxu0 }
 0x59e   :  { %v1177_v21 = vadd.f32 %v1173_v1, %v1153_v63  ;;  %v1092_v6 = vpop.f32.mrb[17].mxu0 }
 0x59f   :  { %v1158_v9 = vrot.slane %v1092_v6, 7  ;;  %v1182_v52 = vrot.slane %v1092_v6, 6  ;;  %v1206_v11 = vrot.slane %v1092_v6, 5  ;;  %v1094_v12 = vpop.f32.mrb[18].mxu0  ;;  %v1154_v54 = vmul.f32 %v1151_v57, %v1092_v6 }
 0x5a0   :  { %v1201_v13 = vadd.f32 %v1197_v45, %v1177_v21  ;;  %v1096_v15 = vpop.f32.mrb[19].mxu0 }
 0x5a1   :  { %v1161_v20 = vsel %vm631_vm12, %v1157_v49, %v1158_v9  ;;  %v1185_v23 = vsel %vm664_vm13, %v1181_v53, %v1182_v52  ;;  %v1209_v50 = vsel %vm697_vm14, %v1205_v55, %v1206_v11  ;;  %v1155_v27 = vmul.f32 %v1151_v57, %v1096_v15 }
 0x5a2   :  { %v1225_v24 = vadd.f32 %v1221_v14, %v1201_v13  ;;  %v1166_v25 = vsel %vm315_vm15, %v1161_v20, 0.0  ;;  %v1190_v43 = vsel %vm319_vm0, %v1185_v23, 0.0  ;;  %v1214_v26 = vsel %vm323_vm1, %v1209_v50, 0.0 }
 0x5a3   :  { %v1174_v59 = vmul.f32 %v1171_v42, %v1166_v25  ;;  %v1159_v18 = vrot.slane %v1096_v15, 7  ;;  %v1198_v29 = vmul.f32 %v1195_v60, %v1190_v43  ;;  %v1183_v30 = vrot.slane %v1096_v15, 6 }
 0x5a4   :  { %v1229_v28 = vmul.f32 %v1225_v24, %v1084_v36  ;;  %v1207_v22 = vrot.slane %v1096_v15, 5  ;;  %v1222_v7 = vmul.f32 %v1219_v44, %v1214_v26  ;;  %v1938_v15 = vld [vmem:[#allocation8 + $0x4] ss:$8 sps:$4 sm:$0xff]  }
 0x5a5   :  { %v1178_v3 = vadd.f32 %v1174_v59, %v1154_v54  ;;  %v1160_v40 = vsel %vm631_vm12, %v1158_v9, %v1159_v18  ;;  %v1163_v8 = vsel %vm631_vm12, %v1159_v18, %v1156_v38  ;;  %v1184_v34 = vsel %vm664_vm13, %v1182_v52, %v1183_v30  ;;  %1482 = vmatprep.subr.bf16.mxu1 %v1938_v15  ;;  %v1947_v59 = vld [vmem:[#allocation8 + $0x34] ss:$8 sps:$4 sm:$0xff]   ;;  %v1948_v18 = vld [vmem:[#allocation8 + $0x40] ss:$8 sps:$4 sm:$0xff]  }
 0x5a6   :  { %v1233_v10 = vmul.f32 %v1229_v28, %v1136_v2  ;;  %v1164_v61 = vsel %vm313_vm2, %v1163_v8, 0.0  ;;  %v1175_v31 = vmul.f32 %v1171_v42, %v1160_v40  ;;  %v1187_v49 = vsel %vm664_vm13, %v1183_v30, %v1180_v46  ;;  %v1956_v28 = vld [vmem:[#allocation8 + $0x64] ss:$8 sps:$4 sm:$0xff]   ;;  %v1957_v30 = vld [vmem:[#allocation8 + $0x70] ss:$8 sps:$4 sm:$0xff]  }
 0x5a7   :  { %v1202_v36 = vadd.f32 %v1198_v29, %v1178_v3  ;;  %v1172_v41 = vmul.f32 %v1171_v42, %v1164_v61  ;;  %v1199_v53 = vmul.f32 %v1195_v60, %v1184_v34  ;;  %v1188_v57 = vsel %vm317_vm3, %v1187_v49, 0.0  ;;  %v1959_v29 = vld [vmem:[#allocation8 + $0x74] ss:$8 sps:$4 sm:$0xff]  }
 0x5a8   :  { %v1179_v55 = vadd.f32 %v1175_v31, %v1155_v27  ;;  %v1208_v38 = vsel %vm697_vm14, %v1206_v11, %v1207_v22  ;;  %v1211_v62 = vsel %vm697_vm14, %v1207_v22, %v1204_v48  ;;  %v1196_v63 = vmul.f32 %v1195_v60, %v1188_v57  ;;  %v1936_v60 = vld [vmem:[#allocation8] ss:$8 sps:$4 sm:$0xff]   ;;  %v1945_v27 = vld [vmem:[#allocation8 + $0x30] ss:$8 sps:$4 sm:$0xff]  }
 0x5a9   :  { %v1226_v39 = vadd.f32 %v1222_v7, %v1202_v36  ;;  %v1212_v47 = vsel %vm321_vm4, %v1211_v62, 0.0  ;;  %v1223_v1 = vmul.f32 %v1219_v44, %v1208_v38  ;;  %v1176_v2 = vadd.f32 %v1172_v41, %v1152_v19  ;;  %1483 = vmatpush1.bf16.msra.mxu1 %v1936_v60 }
 0x5aa   :  { %v1203_v42 = vadd.f32 %v1199_v53, %v1179_v55  ;;  %v1220_v6 = vmul.f32 %v1219_v44, %v1212_v47  ;;  %v1939_v44 = vld [vmem:[#allocation8 + $0x10] ss:$8 sps:$4 sm:$0xff]  }
 0x5ab   :  { %v1230_v46 = vmul.f32 %v1226_v39, %v1090_v5  ;;  %v1200_v45 = vadd.f32 %v1196_v63, %v1176_v2  ;;  %v1941_v5 = vld [vmem:[#allocation8 + $0x14] ss:$8 sps:$4 sm:$0xff]  }
 0x5ac   :  { %v1227_v21 = vadd.f32 %v1223_v1, %v1203_v42  ;;  %1484 = vmatprep.subr.bf16.mxu1 %v1941_v5 }
 0x5ad   :  { %v1234_v9 = vmul.f32 %v2378_v56, %v1230_v46  ;;  %v1224_v13 = vadd.f32 %v1220_v6, %v1200_v45  ;;  %v1944_v56 = vld [vmem:[#allocation8 + $0x24] ss:$8 sps:$4 sm:$0xff]   ;;  %1485 = vmatpush1.bf16.msra.mxu1 %v1939_v44 }
 0x5ae   :  { %v1231_v52 = vmul.f32 %v1227_v21, %v1094_v12  ;;  %v1942_v12 = vld [vmem:[#allocation8 + $0x20] ss:$8 sps:$4 sm:$0xff]   ;;  %1486 = vmatprep.subr.bf16.mxu1 %v1944_v56 }
 0x5af   :  { %v1228_v11 = vmul.f32 %v1224_v13, %v2366_v17 }
 0x5b0   :  { %v1235_v37 = vmul.f32 %v2388_v51, %v1231_v52 }
 0x5b1   :  { %v1232_v48 = vmul.f32 %v1228_v11, %v2382_v58  ;;  %1487 = vmatpush1.bf16.msra.mxu1 %v1942_v12 }
 0x5b2   :  { %v1237_v4 = vpack.c.bf16 %v1235_v37, %v1234_v9  ;;  %1488 = vmatprep.subr.bf16.mxu1 %v1947_v59 }
 0x5b3   :  { %v1236_v14 = vpack.c.bf16 %v1233_v10, %v1232_v48 }
 0x5b5   :  { %1819 = vmatprep.mubr.bf16.mxu0 %v1236_v14  ;;  %1489 = vmatpush1.bf16.msra.mxu1 %v1945_v27 }
 0x5b6   :  { %1820 = vmatmul.mubr.bf16.vlgmr.msra.gmra.mrb[20].mxu0 %v1237_v4 }
 0x689   :  { %v1821_v17 = vpop.f32.mrb[20].mxu0 }
 0x68a   :  { %v1337_v51 = vpop.f32.mrb[21].mxu0  ;;  %v1354_v23 = vadd.f32 %v1821_v17, %v2344_v32  ;;  %v1953_v32 = vld [vmem:[#allocation8 + $0x54] ss:$8 sps:$4 sm:$0xff]  }
 0x68b   :  { %v1352_v58 = vadd.f32 %v1337_v51, %v2341_v16  ;;  %v1822_v19 = vpop.f32.mrb[22].mxu0  ;;  %v1950_v16 = vld [vmem:[#allocation8 + $0x44] ss:$8 sps:$4 sm:$0xff]  }
 0x68c   :  { %v1340_v20 = vpop.f32.mrb[23].mxu0  ;;  %v1355_v25 = vadd.f32 %v1822_v19, %v2352_v35  ;;  %v1358_v26 = vmul.f32 %v1354_v23, %v1354_v23  ;;  %1490 = vmatprep.subr.bf16.mxu1 %v1950_v16  ;;  %v1954_v35 = vld [vmem:[#allocation8 + $0x60] ss:$8 sps:$4 sm:$0xff]  }
 0x68d   :  { %v1353_v50 = vadd.f32 %v1340_v20, %v2347_v33  ;;  %v1356_v24 = vmul.f32 %v1352_v58, %v1352_v58  ;;  %1491 = vmatpush1.bf16.msra.mxu1 %v1948_v18  ;;  %v1951_v33 = vld [vmem:[#allocation8 + $0x50] ss:$8 sps:$4 sm:$0xff]  }
 0x68e   :  { %v1359_v54 = vmul.f32 %v1355_v25, %v1355_v25  ;;  %1492 = vmatprep.subr.bf16.mxu1 %v1953_v32 }
 0x68f   :  { %1360 = vadd.xlane.f32.xlu1 %v1356_v24  ;;  %v1357_v43 = vmul.f32 %v1353_v50, %v1353_v50 }
 0x691   :  { %1362 = vadd.xlane.f32.xlu0 %v1357_v43  ;;  %1493 = vmatpush1.bf16.msra.mxu1 %v1951_v33 }
 0x692   :  { %1494 = vmatprep.subr.bf16.mxu1 %v1956_v28 }
 0x693   :  { %1364 = vadd.xlane.f32.xlu1 %v1358_v26 }
 0x695   :  { %1366 = vadd.xlane.f32.xlu0 %v1359_v54  ;;  %1495 = vmatpush1.bf16.msra.mxu1 %v1954_v35 }
 0x696   :  { %1496 = vmatprep.subr.bf16.mxu1 %v1959_v29 }
 0x699   :  { %1497 = vmatpush1.bf16.msra.mxu1 %v1957_v30 }
 0x71c   :  { %v1361_v22 = vpop.xlane.xlu1 %1360 }
 0x71d   :  { %v1368_v3 = vmul.f32 0.0078125, %v1361_v22 }
 0x71e   :  { %v1363_v7 = vpop.xlane.xlu0 %1362 }
 0x71f   :  { %v1372_v40 = vadd.f32 1e-05, %v1368_v3  ;;  %v1369_v8 = vmul.f32 0.0078125, %v1363_v7 }
 0x720   :  { %v1365_v10 = vpop.xlane.xlu1 %1364 }
 0x721   :  { %1976 = vrsqrt.f32 %v1372_v40  ;;  %v1373_v61 = vadd.f32 1e-05, %v1369_v8  ;;  %v1370_v31 = vmul.f32 0.0078125, %v1365_v10 }
 0x722   :  { %v1367_v34 = vpop.xlane.xlu0 %1366 }
 0x723   :  { %1978 = vrsqrt.f32 %v1373_v61  ;;  %v1371_v36 = vmul.f32 0.0078125, %v1367_v34  ;;  %v1374_v41 = vadd.f32 1e-05, %v1370_v31 }
 0x725   :  { %v1375_v49 = vadd.f32 1e-05, %v1371_v36 }
 0x727   :  { %1980 = vrsqrt.f32 %v1375_v49 }
 0x728   :  { %1982 = vrsqrt.f32 %v1374_v41 }
 0x72b   :  { %v1977_v53 = vpop.eup %1976 }
 0x72c   :  { %v1380_v57 = vmul.f32 %v1977_v53, %v1352_v58 }
 0x72d   :  { %v1979_v55 = vpop.eup %1978 }
 0x72e   :  { %v1381_v38 = vmul.f32 %v1979_v55, %v1353_v50 }
 0x730   :  { %v1384_v62 = vpack.c.bf16 %v1381_v38, %v1380_v57 }
 0x731   :  { %v1981_v39 = vpop.eup %1980 }
 0x732   :  { %1515 = vmatmul.mubr.bf16.vlgmr.msra.gmra.mrb[16].mxu1 %v1384_v62  ;;  %v1983_v47 = vpop.eup %1982  ;;  %v1383_v63 = vmul.f32 %v1981_v39, %v1355_v25 }
 0x733   :  { %1524 = vmatprep.mubr.bf16.mxu1 %v2112_v0  ;;  %v1382_v42 = vmul.f32 %v1983_v47, %v1354_v23 }
 0x735   :  { %v1385_v1 = vpack.c.bf16 %v1383_v63, %v1382_v42 }
 0x73a   :  { %1525 = vmatmul.mubr.bf16.gmra.mrb[20].mxu1 %v1385_v1 }
 0x805   :  { %v1516_v2 = vpop.f32.mrb[16].mxu1 }
 0x806   :  { %1535 = vst [vmem:[#allocation10] sm:$0xff] %v1516_v2  ;;  %v1518_v46 = vpop.f32.mrb[17].mxu1 }
 0x807   :  { %1536 = vst [vmem:[#allocation10 + $0x8] sm:$0xff] %v1518_v46  ;;  %v1520_v21 = vpop.f32.mrb[18].mxu1 }
 0x808   :  { %1537 = vst [vmem:[#allocation10 + $0x10] sm:$0xff] %v1520_v21  ;;  %v1522_v45 = vpop.f32.mrb[19].mxu1 }
 0x809   :  { %1538 = vst [vmem:[#allocation10 + $0x18] sm:$0xff] %v1522_v45 }
 0x80d   :  { %v1526_v6 = vpop.f32.mrb[20].mxu1 }
 0x80e   :  { %1539 = vst [vmem:[#allocation10 + $0x20] sm:$0xff] %v1526_v6  ;;  %v1528_v9 = vpop.f32.mrb[21].mxu1 }
 0x80f   :  { %1540 = vst [vmem:[#allocation10 + $0x28] sm:$0xff] %v1528_v9  ;;  %v1530_v52 = vpop.f32.mrb[22].mxu1 }
 0x810   :  { %1541 = vst [vmem:[#allocation10 + $0x30] sm:$0xff] %v1530_v52  ;;  %v1532_v0 = vpop.f32.mrb[23].mxu1 }
 0x811   :  { %1542 = vst [vmem:[#allocation10 + $0x38] sm:$0xff] %v1532_v0 }
 0x812   :  { %2083 = shalt.err (!%p2080_p8)
}
 0x813   :  { %s2084_s12 = scalar_lea.hbm %s2454_s6, 1024 }
 0x814   :  { %p2085_p9 = scmp.ne.s32.totalorder %s2454_s6, %s2084_s12  ;;  %p2088_p10 = scmp.lt.u32.totalorder %s2084_s12, %s2454_s6 }
 0x816   :  { %p2090_p11 = pnand %p2088_p10, %p2085_p9 }
 0x818   :  { %2093 = shalt.err (!%p2090_p11)
}
 0x819   :  { %s2115_s17 = smov 256   ;;  %s2116_s18 = smov 16  }
 0x81a   :  { %1554 = dma.vmem_to_hbm [thread:$0]  %s1549_s9, 1024, %s2454_s6, [#allocation4], %s2115_s17, %s2115_s17, %s2116_s18  }
 0x81b   :  { %2100 = dma.done.wait [#allocation4], 1024  }
 0x81c   :  { %2101 = vsyncadd [#allocation4], 4294966272 }
 0x81d   :  { %1558 = vsyncpa [#allocation3], 1 }
 0x81e   :  { %1559 = vsyncpa [#allocation6], 1 }
 0x81f   :  { %1560 = vsyncpa [#allocation9], 1 }
 0x820   :  { %1561 = vsyncpa [#allocation4], 1 }

</bundles_post_ra>
